<compile_context>
chip_gen: v7x
topology: tpu7x:2x2x1
jax: 0.10.0
libtpu: 0.0.40
codegen_flags: <defaults>
</compile_context>

<pallas_src>
import functools

import jax
import jax.numpy as jnp
from jax import lax
from jax.experimental import pallas as pl
from jax.experimental.pallas import tpu as pltpu


def _round_up(a: int, b: int) -> int:
    return ((a + b - 1) // b) * b


def _lif_kernel(x_ref, o_ref, mem_ref, *, tau: float, v_th: float, sub_rows: int):
    # x_ref / o_ref: (t_chunk, rows_block, 128) for this grid step.
    # mem_ref: (rows_block, 128) f32 scratch carrying the membrane across the
    # T-chunk grid axis (axis 1, "arbitrary", iterated last/fastest).
    @pl.when(pl.program_id(1) == 0)
    def _init():
        mem_ref[...] = jnp.zeros_like(mem_ref)

    t_chunk = x_ref.shape[0]
    rows_block = x_ref.shape[1]
    n_sub = rows_block // sub_rows

    def row_body(s, carry):
        r0 = pl.multiple_of(s * sub_rows, sub_rows)

        def t_body(t, mem):
            mem = tau * mem + x_ref[t, pl.ds(r0, sub_rows), :]
            fired = mem > v_th                      # == (mem - v_th > 0) for finite f32
            o_ref[t, pl.ds(r0, sub_rows), :] = (
                jnp.where(fired, 1.0, 0.0).astype(o_ref.dtype))
            return jnp.where(fired, 0.0, mem)       # reset fired units

        mem0 = mem_ref[pl.ds(r0, sub_rows), :]
        mem_fin = lax.fori_loop(0, t_chunk, t_body, mem0, unroll=t_chunk)
        mem_ref[pl.ds(r0, sub_rows), :] = mem_fin
        return carry

    lax.fori_loop(0, n_sub, row_body, 0)


def lif_legacy_forward(x, *, thresh=1.0, tau=0.25, max_t_chunk=8,
                       target_buffer_bytes=2 * 1024 * 1024,
                       out_dtype=jnp.float32):
    """x: (T, N, C, H, W) -> spikes of same shape (out_dtype, default f32)."""
    T = x.shape[0]
    feat_shape = x.shape[1:]
    M = 1
    for d in feat_shape:
        M *= d

    if x.dtype != jnp.float32:
        x = x.astype(jnp.float32)
    x2 = x.reshape(T, M)

    # --- lane / time layout ------------------------------------------------
    M_lane = _round_up(M, 128)
    rows = M_lane // 128

    t_chunk = int(min(T, max_t_chunk))
    n_tc = pl.cdiv(T, t_chunk)
    T_pad = n_tc * t_chunk

    # --- generation-aware tile sizing ---------------------------------------
    try:
        vmem_cap = int(pltpu.get_tpu_info().vmem_capacity_bytes)
    except Exception:  # pragma: no cover - fallback if query unavailable
        vmem_cap = 64 * 1024 * 1024  # conservative (v7x per-TC size)

    # Each pipelined buffer ~1-2 MiB; never let 2 arrays x 2 buffers exceed
    # a quarter of VMEM.
    buf_target = min(int(target_buffer_bytes), vmem_cap // 16)
    rows_block = buf_target // (t_chunk * 128 * 4)
    rows_block = max(8, (rows_block // 8) * 8)

    # Keep at least 2 row blocks when possible so the "parallel" rows axis can
    # be sharded across both v7x TensorCores (harmless on v5e/v6e).
    if rows_block * 2 > rows:
        if rows > 8:
            rows_block = max(8, _round_up(pl.cdiv(rows, 2), 8))
        else:
            rows_block = 8
    n_rb = pl.cdiv(rows, rows_block)
    rows_pad = n_rb * rows_block

    # --- pad so every block is full (no reliance on OOB semantics) ----------
    if (T_pad != T) or (rows_pad * 128 != M):
        x2 = jnp.pad(x2, ((0, T_pad - T), (0, rows_pad * 128 - M)))
    x3 = x2.reshape(T_pad, rows_pad, 128)

    sub_rows = 16 if rows_block % 16 == 0 else 8

    block = (t_chunk, rows_block, 128)
    in_block_bytes = t_chunk * rows_block * 128 * 4
    out_block_bytes = t_chunk * rows_block * 128 * jnp.dtype(out_dtype).itemsize
    footprint = 2 * (in_block_bytes + out_block_bytes) + rows_block * 128 * 4
    vmem_limit = int(min(vmem_cap * 3 // 4,
                         max(footprint + (4 << 20), 16 << 20)))

    kernel = functools.partial(
        _lif_kernel, tau=float(tau), v_th=float(thresh), sub_rows=sub_rows)

    out = pl.pallas_call(
        kernel,
        out_shape=jax.ShapeDtypeStruct((T_pad, rows_pad, 128), out_dtype),
        grid_spec=pltpu.PrefetchScalarGridSpec(
            num_scalar_prefetch=0,
            grid=(n_rb, n_tc),
            in_specs=[pl.BlockSpec(block, lambda i, tc: (tc, i, 0))],
            out_specs=pl.BlockSpec(block, lambda i, tc: (tc, i, 0)),
            scratch_shapes=[pltpu.VMEM((rows_block, 128), jnp.float32)],
        ),
        compiler_params=pltpu.CompilerParams(
            dimension_semantics=("parallel", "arbitrary"),
            vmem_limit_bytes=vmem_limit,
        ),
    )(x3)

    out = out.reshape(T_pad, rows_pad * 128)[:T, :M]
    return out.reshape((T,) + feat_shape)


def _lif_reference(x, thresh=1.0, tau=0.25):
    """Pure-JAX reference matching the PyTorch loop exactly."""
    def step(mem, xt):
        mem = tau * mem + xt
        spike = (mem - thresh > 0.0).astype(jnp.float32)
        mem = mem * (1.0 - spike)
        return mem, spike

    mem0 = jnp.zeros_like(x[0])
    _, spikes = lax.scan(step, mem0, x)
    return spikes


if __name__ == "__main__":
    # Small shapes consistent with the module: time-major spiking input.
    T, N, C, H, W = 8, 2, 4, 16, 16
    key = jax.random.PRNGKey(0)
    x = jax.random.normal(key, (T, N, C, H, W), dtype=jnp.float32) * 1.5

    out = lif_legacy_forward(x, thresh=1.0, tau=0.25)
    out = jax.block_until_ready(out)

    ref = _lif_reference(x, thresh=1.0, tau=0.25)
    assert out.shape == x.shape
    assert out.dtype == jnp.float32
    assert jnp.allclose(out, ref, atol=1e-6), "mismatch vs reference"

    # TODO(synk): ZIF surrogate-gradient backward (rectangular window) is not
    # implemented; this kernel covers the forward pass only.
    print("KERNEL_OK")
</pallas_src>

<mosaic_0001>
module attributes {stable_mosaic.version = 11 : i64} {
  func.func @_lif_kernel(%arg0: i32, %arg1: i32, %arg2: memref<8x8x128xf32, #tpu.memory_space<vmem>>, %arg3: memref<8x8x128xf32, #tpu.memory_space<vmem>>, %arg4: memref<8x128xf32, #tpu.memory_space<vmem>>) attributes {dimension_semantics = [#tpu.dimension_semantics<parallel>, #tpu.dimension_semantics<arbitrary>], iteration_bounds = array<i64: 2, 1>, scalar_prefetch = 0 : i64, scratch_operands = 1 : i64, tpu.core_type = #tpu.core_type<tc>, window_params = [{transform_indices = @transform_0, window_bounds = array<i64: 8, 8, 128>}, {transform_indices = @transform_1, window_bounds = array<i64: 8, 8, 128>}]} {
    %c0_i32 = arith.constant 0 : i32
    %0 = arith.cmpi eq, %arg1, %c0_i32 : i32
    %1 = arith.extui %0 : i1 to i32
    %c0_i32_0 = arith.constant 0 : i32
    %2 = arith.cmpi ne, %1, %c0_i32_0 : i32
    scf.if %2 {
      %cst_61 = arith.constant 0.000000e+00 : f32
      %161 = vector.broadcast %cst_61 : f32 to vector<8x128xf32>
      %c0_62 = arith.constant 0 : index
      %c0_63 = arith.constant 0 : index
      %162 = vector.load %arg4[%c0_62, %c0_63] : memref<8x128xf32, #tpu.memory_space<vmem>>, vector<8x128xf32>
      tpu.vector_store %arg4[%c0_62, %c0_63], %161 {strides = array<i32>} : memref<8x128xf32, #tpu.memory_space<vmem>>, vector<8x128xf32>,
    } else {
    }
    %c0_i32_1 = arith.constant 0 : i32
    %c8_i32 = arith.constant 8 : i32
    %3 = arith.muli %c0_i32_1, %c8_i32 : i32
    %4 = tpu.assume_multiple %3, 8 : i32
    %5 = arith.index_cast %4 : i32 to index
    %c0 = arith.constant 0 : index
    %6 = vector.load %arg4[%5, %c0] : memref<8x128xf32, #tpu.memory_space<vmem>>, vector<8x128xf32>
    %c0_i32_2 = arith.constant 0 : i32
    %cst = arith.constant 2.500000e-01 : f32
    %7 = vector.broadcast %cst : f32 to vector<8x128xf32>
    %8 = arith.mulf %7, %6 : vector<8x128xf32>
    %9 = arith.index_cast %c0_i32_2 : i32 to index
    %10 = arith.index_cast %4 : i32 to index
    %c0_3 = arith.constant 0 : index
    %11 = vector.load %arg2[%9, %10, %c0_3] : memref<8x8x128xf32, #tpu.memory_space<vmem>>, vector<1x8x128xf32>
    %12 = vector.shape_cast %11 : vector<1x8x128xf32> to vector<8x128xf32>
    %13 = arith.addf %8, %12 : vector<8x128xf32>
    %cst_4 = arith.constant 1.000000e+00 : f32
    %14 = vector.broadcast %cst_4 : f32 to vector<8x128xf32>
    %15 = arith.cmpf ogt, %13, %14 : vector<8x128xf32>
    %cst_5 = arith.constant 1.000000e+00 : f32
    %cst_6 = arith.constant 0.000000e+00 : f32
    %16 = vector.broadcast %cst_5 : f32 to vector<8x128xf32>
    %17 = vector.broadcast %cst_6 : f32 to vector<8x128xf32>
    %18 = arith.select %15, %16, %17 : vector<8x128xi1>, vector<8x128xf32>
    %19 = arith.index_cast %c0_i32_2 : i32 to index
    %20 = arith.index_cast %4 : i32 to index
    %c0_7 = arith.constant 0 : index
    %21 = vector.load %arg3[%19, %20, %c0_7] : memref<8x8x128xf32, #tpu.memory_space<vmem>>, vector<1x8x128xf32>
    %22 = vector.shape_cast %21 : vector<1x8x128xf32> to vector<8x128xf32>
    %23 = vector.shape_cast %18 : vector<8x128xf32> to vector<1x8x128xf32>
    tpu.vector_store %arg3[%19, %20, %c0_7], %23 {strides = array<i32>} : memref<8x8x128xf32, #tpu.memory_space<vmem>>, vector<1x8x128xf32>,
    %cst_8 = arith.constant 0.000000e+00 : f32
    %24 = vector.broadcast %cst_8 : f32 to vector<8x128xf32>
    %25 = arith.select %15, %24, %13 : vector<8x128xi1>, vector<8x128xf32>
    %c1_i32 = arith.constant 1 : i32
    %cst_9 = arith.constant 2.500000e-01 : f32
    %26 = vector.broadcast %cst_9 : f32 to vector<8x128xf32>
    %27 = arith.mulf %26, %25 : vector<8x128xf32>
    %28 = arith.index_cast %c1_i32 : i32 to index
    %29 = arith.index_cast %4 : i32 to index
    %c0_10 = arith.constant 0 : index
    %30 = vector.load %arg2[%28, %29, %c0_10] : memref<8x8x128xf32, #tpu.memory_space<vmem>>, vector<1x8x128xf32>
    %31 = vector.shape_cast %30 : vector<1x8x128xf32> to vector<8x128xf32>
    %32 = arith.addf %27, %31 : vector<8x128xf32>
    %cst_11 = arith.constant 1.000000e+00 : f32
    %33 = vector.broadcast %cst_11 : f32 to vector<8x128xf32>
    %34 = arith.cmpf ogt, %32, %33 : vector<8x128xf32>
    %cst_12 = arith.constant 1.000000e+00 : f32
    %cst_13 = arith.constant 0.000000e+00 : f32
    %35 = vector.broadcast %cst_12 : f32 to vector<8x128xf32>
    %36 = vector.broadcast %cst_13 : f32 to vector<8x128xf32>
    %37 = arith.select %34, %35, %36 : vector<8x128xi1>, vector<8x128xf32>
    %38 = arith.index_cast %c1_i32 : i32 to index
    %39 = arith.index_cast %4 : i32 to index
    %c0_14 = arith.constant 0 : index
    %40 = vector.load %arg3[%38, %39, %c0_14] : memref<8x8x128xf32, #tpu.memory_space<vmem>>, vector<1x8x128xf32>
    %41 = vector.shape_cast %40 : vector<1x8x128xf32> to vector<8x128xf32>
    %42 = vector.shape_cast %37 : vector<8x128xf32> to vector<1x8x128xf32>
    tpu.vector_store %arg3[%38, %39, %c0_14], %42 {strides = array<i32>} : memref<8x8x128xf32, #tpu.memory_space<vmem>>, vector<1x8x128xf32>,
    %cst_15 = arith.constant 0.000000e+00 : f32
    %43 = vector.broadcast %cst_15 : f32 to vector<8x128xf32>
    %44 = arith.select %34, %43, %32 : vector<8x128xi1>, vector<8x128xf32>
    %c2_i32 = arith.constant 2 : i32
    %cst_16 = arith.constant 2.500000e-01 : f32
    %45 = vector.broadcast %cst_16 : f32 to vector<8x128xf32>
    %46 = arith.mulf %45, %44 : vector<8x128xf32>
    %47 = arith.index_cast %c2_i32 : i32 to index
    %48 = arith.index_cast %4 : i32 to index
    %c0_17 = arith.constant 0 : index
    %49 = vector.load %arg2[%47, %48, %c0_17] : memref<8x8x128xf32, #tpu.memory_space<vmem>>, vector<1x8x128xf32>
    %50 = vector.shape_cast %49 : vector<1x8x128xf32> to vector<8x128xf32>
    %51 = arith.addf %46, %50 : vector<8x128xf32>
    %cst_18 = arith.constant 1.000000e+00 : f32
    %52 = vector.broadcast %cst_18 : f32 to vector<8x128xf32>
    %53 = arith.cmpf ogt, %51, %52 : vector<8x128xf32>
    %cst_19 = arith.constant 1.000000e+00 : f32
    %cst_20 = arith.constant 0.000000e+00 : f32
    %54 = vector.broadcast %cst_19 : f32 to vector<8x128xf32>
    %55 = vector.broadcast %cst_20 : f32 to vector<8x128xf32>
    %56 = arith.select %53, %54, %55 : vector<8x128xi1>, vector<8x128xf32>
    %57 = arith.index_cast %c2_i32 : i32 to index
    %58 = arith.index_cast %4 : i32 to index
    %c0_21 = arith.constant 0 : index
    %59 = vector.load %arg3[%57, %58, %c0_21] : memref<8x8x128xf32, #tpu.memory_space<vmem>>, vector<1x8x128xf32>
    %60 = vector.shape_cast %59 : vector<1x8x128xf32> to vector<8x128xf32>
    %61 = vector.shape_cast %56 : vector<8x128xf32> to vector<1x8x128xf32>
    tpu.vector_store %arg3[%57, %58, %c0_21], %61 {strides = array<i32>} : memref<8x8x128xf32, #tpu.memory_space<vmem>>, vector<1x8x128xf32>,
    %cst_22 = arith.constant 0.000000e+00 : f32
    %62 = vector.broadcast %cst_22 : f32 to vector<8x128xf32>
    %63 = arith.select %53, %62, %51 : vector<8x128xi1>, vector<8x128xf32>
    %c3_i32 = arith.constant 3 : i32
    %cst_23 = arith.constant 2.500000e-01 : f32
    %64 = vector.broadcast %cst_23 : f32 to vector<8x128xf32>
    %65 = arith.mulf %64, %63 : vector<8x128xf32>
    %66 = arith.index_cast %c3_i32 : i32 to index
    %67 = arith.index_cast %4 : i32 to index
    %c0_24 = arith.constant 0 : index
    %68 = vector.load %arg2[%66, %67, %c0_24] : memref<8x8x128xf32, #tpu.memory_space<vmem>>, vector<1x8x128xf32>
    %69 = vector.shape_cast %68 : vector<1x8x128xf32> to vector<8x128xf32>
    %70 = arith.addf %65, %69 : vector<8x128xf32>
    %cst_25 = arith.constant 1.000000e+00 : f32
    %71 = vector.broadcast %cst_25 : f32 to vector<8x128xf32>
    %72 = arith.cmpf ogt, %70, %71 : vector<8x128xf32>
    %cst_26 = arith.constant 1.000000e+00 : f32
    %cst_27 = arith.constant 0.000000e+00 : f32
    %73 = vector.broadcast %cst_26 : f32 to vector<8x128xf32>
    %74 = vector.broadcast %cst_27 : f32 to vector<8x128xf32>
    %75 = arith.select %72, %73, %74 : vector<8x128xi1>, vector<8x128xf32>
    %76 = arith.index_cast %c3_i32 : i32 to index
    %77 = arith.index_cast %4 : i32 to index
    %c0_28 = arith.constant 0 : index
    %78 = vector.load %arg3[%76, %77, %c0_28] : memref<8x8x128xf32, #tpu.memory_space<vmem>>, vector<1x8x128xf32>
    %79 = vector.shape_cast %78 : vector<1x8x128xf32> to vector<8x128xf32>
    %80 = vector.shape_cast %75 : vector<8x128xf32> to vector<1x8x128xf32>
    tpu.vector_store %arg3[%76, %77, %c0_28], %80 {strides = array<i32>} : memref<8x8x128xf32, #tpu.memory_space<vmem>>, vector<1x8x128xf32>,
    %cst_29 = arith.constant 0.000000e+00 : f32
    %81 = vector.broadcast %cst_29 : f32 to vector<8x128xf32>
    %82 = arith.select %72, %81, %70 : vector<8x128xi1>, vector<8x128xf32>
    %c4_i32 = arith.constant 4 : i32
    %cst_30 = arith.constant 2.500000e-01 : f32
    %83 = vector.broadcast %cst_30 : f32 to vector<8x128xf32>
    %84 = arith.mulf %83, %82 : vector<8x128xf32>
    %85 = arith.index_cast %c4_i32 : i32 to index
    %86 = arith.index_cast %4 : i32 to index
    %c0_31 = arith.constant 0 : index
    %87 = vector.load %arg2[%85, %86, %c0_31] : memref<8x8x128xf32, #tpu.memory_space<vmem>>, vector<1x8x128xf32>
    %88 = vector.shape_cast %87 : vector<1x8x128xf32> to vector<8x128xf32>
    %89 = arith.addf %84, %88 : vector<8x128xf32>
    %cst_32 = arith.constant 1.000000e+00 : f32
    %90 = vector.broadcast %cst_32 : f32 to vector<8x128xf32>
    %91 = arith.cmpf ogt, %89, %90 : vector<8x128xf32>
    %cst_33 = arith.constant 1.000000e+00 : f32
    %cst_34 = arith.constant 0.000000e+00 : f32
    %92 = vector.broadcast %cst_33 : f32 to vector<8x128xf32>
    %93 = vector.broadcast %cst_34 : f32 to vector<8x128xf32>
    %94 = arith.select %91, %92, %93 : vector<8x128xi1>, vector<8x128xf32>
    %95 = arith.index_cast %c4_i32 : i32 to index
    %96 = arith.index_cast %4 : i32 to index
    %c0_35 = arith.constant 0 : index
    %97 = vector.load %arg3[%95, %96, %c0_35] : memref<8x8x128xf32, #tpu.memory_space<vmem>>, vector<1x8x128xf32>
    %98 = vector.shape_cast %97 : vector<1x8x128xf32> to vector<8x128xf32>
    %99 = vector.shape_cast %94 : vector<8x128xf32> to vector<1x8x128xf32>
    tpu.vector_store %arg3[%95, %96, %c0_35], %99 {strides = array<i32>} : memref<8x8x128xf32, #tpu.memory_space<vmem>>, vector<1x8x128xf32>,
    %cst_36 = arith.constant 0.000000e+00 : f32
    %100 = vector.broadcast %cst_36 : f32 to vector<8x128xf32>
    %101 = arith.select %91, %100, %89 : vector<8x128xi1>, vector<8x128xf32>
    %c5_i32 = arith.constant 5 : i32
    %cst_37 = arith.constant 2.500000e-01 : f32
    %102 = vector.broadcast %cst_37 : f32 to vector<8x128xf32>
    %103 = arith.mulf %102, %101 : vector<8x128xf32>
    %104 = arith.index_cast %c5_i32 : i32 to index
    %105 = arith.index_cast %4 : i32 to index
    %c0_38 = arith.constant 0 : index
    %106 = vector.load %arg2[%104, %105, %c0_38] : memref<8x8x128xf32, #tpu.memory_space<vmem>>, vector<1x8x128xf32>
    %107 = vector.shape_cast %106 : vector<1x8x128xf32> to vector<8x128xf32>
    %108 = arith.addf %103, %107 : vector<8x128xf32>
    %cst_39 = arith.constant 1.000000e+00 : f32
    %109 = vector.broadcast %cst_39 : f32 to vector<8x128xf32>
    %110 = arith.cmpf ogt, %108, %109 : vector<8x128xf32>
    %cst_40 = arith.constant 1.000000e+00 : f32
    %cst_41 = arith.constant 0.000000e+00 : f32
    %111 = vector.broadcast %cst_40 : f32 to vector<8x128xf32>
    %112 = vector.broadcast %cst_41 : f32 to vector<8x128xf32>
    %113 = arith.select %110, %111, %112 : vector<8x128xi1>, vector<8x128xf32>
    %114 = arith.index_cast %c5_i32 : i32 to index
    %115 = arith.index_cast %4 : i32 to index
    %c0_42 = arith.constant 0 : index
    %116 = vector.load %arg3[%114, %115, %c0_42] : memref<8x8x128xf32, #tpu.memory_space<vmem>>, vector<1x8x128xf32>
    %117 = vector.shape_cast %116 : vector<1x8x128xf32> to vector<8x128xf32>
    %118 = vector.shape_cast %113 : vector<8x128xf32> to vector<1x8x128xf32>
    tpu.vector_store %arg3[%114, %115, %c0_42], %118 {strides = array<i32>} : memref<8x8x128xf32, #tpu.memory_space<vmem>>, vector<1x8x128xf32>,
    %cst_43 = arith.constant 0.000000e+00 : f32
    %119 = vector.broadcast %cst_43 : f32 to vector<8x128xf32>
    %120 = arith.select %110, %119, %108 : vector<8x128xi1>, vector<8x128xf32>
    %c6_i32 = arith.constant 6 : i32
    %cst_44 = arith.constant 2.500000e-01 : f32
    %121 = vector.broadcast %cst_44 : f32 to vector<8x128xf32>
    %122 = arith.mulf %121, %120 : vector<8x128xf32>
    %123 = arith.index_cast %c6_i32 : i32 to index
    %124 = arith.index_cast %4 : i32 to index
    %c0_45 = arith.constant 0 : index
    %125 = vector.load %arg2[%123, %124, %c0_45] : memref<8x8x128xf32, #tpu.memory_space<vmem>>, vector<1x8x128xf32>
    %126 = vector.shape_cast %125 : vector<1x8x128xf32> to vector<8x128xf32>
    %127 = arith.addf %122, %126 : vector<8x128xf32>
    %cst_46 = arith.constant 1.000000e+00 : f32
    %128 = vector.broadcast %cst_46 : f32 to vector<8x128xf32>
    %129 = arith.cmpf ogt, %127, %128 : vector<8x128xf32>
    %cst_47 = arith.constant 1.000000e+00 : f32
    %cst_48 = arith.constant 0.000000e+00 : f32
    %130 = vector.broadcast %cst_47 : f32 to vector<8x128xf32>
    %131 = vector.broadcast %cst_48 : f32 to vector<8x128xf32>
    %132 = arith.select %129, %130, %131 : vector<8x128xi1>, vector<8x128xf32>
    %133 = arith.index_cast %c6_i32 : i32 to index
    %134 = arith.index_cast %4 : i32 to index
    %c0_49 = arith.constant 0 : index
    %135 = vector.load %arg3[%133, %134, %c0_49] : memref<8x8x128xf32, #tpu.memory_space<vmem>>, vector<1x8x128xf32>
    %136 = vector.shape_cast %135 : vector<1x8x128xf32> to vector<8x128xf32>
    %137 = vector.shape_cast %132 : vector<8x128xf32> to vector<1x8x128xf32>
    tpu.vector_store %arg3[%133, %134, %c0_49], %137 {strides = array<i32>} : memref<8x8x128xf32, #tpu.memory_space<vmem>>, vector<1x8x128xf32>,
    %cst_50 = arith.constant 0.000000e+00 : f32
    %138 = vector.broadcast %cst_50 : f32 to vector<8x128xf32>
    %139 = arith.select %129, %138, %127 : vector<8x128xi1>, vector<8x128xf32>
    %c7_i32 = arith.constant 7 : i32
    %cst_51 = arith.constant 2.500000e-01 : f32
    %140 = vector.broadcast %cst_51 : f32 to vector<8x128xf32>
    %141 = arith.mulf %140, %139 : vector<8x128xf32>
    %142 = arith.index_cast %c7_i32 : i32 to index
    %143 = arith.index_cast %4 : i32 to index
    %c0_52 = arith.constant 0 : index
    %144 = vector.load %arg2[%142, %143, %c0_52] : memref<8x8x128xf32, #tpu.memory_space<vmem>>, vector<1x8x128xf32>
    %145 = vector.shape_cast %144 : vector<1x8x128xf32> to vector<8x128xf32>
    %146 = arith.addf %141, %145 : vector<8x128xf32>
    %cst_53 = arith.constant 1.000000e+00 : f32
    %147 = vector.broadcast %cst_53 : f32 to vector<8x128xf32>
    %148 = arith.cmpf ogt, %146, %147 : vector<8x128xf32>
    %cst_54 = arith.constant 1.000000e+00 : f32
    %cst_55 = arith.constant 0.000000e+00 : f32
    %149 = vector.broadcast %cst_54 : f32 to vector<8x128xf32>
    %150 = vector.broadcast %cst_55 : f32 to vector<8x128xf32>
    %151 = arith.select %148, %149, %150 : vector<8x128xi1>, vector<8x128xf32>
    %152 = arith.index_cast %c7_i32 : i32 to index
    %153 = arith.index_cast %4 : i32 to index
    %c0_56 = arith.constant 0 : index
    %154 = vector.load %arg3[%152, %153, %c0_56] : memref<8x8x128xf32, #tpu.memory_space<vmem>>, vector<1x8x128xf32>
    %155 = vector.shape_cast %154 : vector<1x8x128xf32> to vector<8x128xf32>
    %156 = vector.shape_cast %151 : vector<8x128xf32> to vector<1x8x128xf32>
    tpu.vector_store %arg3[%152, %153, %c0_56], %156 {strides = array<i32>} : memref<8x8x128xf32, #tpu.memory_space<vmem>>, vector<1x8x128xf32>,
    %cst_57 = arith.constant 0.000000e+00 : f32
    %157 = vector.broadcast %cst_57 : f32 to vector<8x128xf32>
    %158 = arith.select %148, %157, %146 : vector<8x128xi1>, vector<8x128xf32>
    %c8_i32_58 = arith.constant 8 : i32
    %159 = arith.index_cast %4 : i32 to index
    %c0_59 = arith.constant 0 : index
    %160 = vector.load %arg4[%159, %c0_59] : memref<8x128xf32, #tpu.memory_space<vmem>>, vector<8x128xf32>
    tpu.vector_store %arg4[%159, %c0_59], %158 {strides = array<i32>} : memref<8x128xf32, #tpu.memory_space<vmem>>, vector<8x128xf32>,
    %c1_i32_60 = arith.constant 1 : i32
    return
  }
  func.func @transform_0(%arg0: i32, %arg1: i32) -> (i32, i32, i32) {
    %c0_i32 = arith.constant 0 : i32
    %c0_i32_0 = arith.constant 0 : i32
    return %arg1, %arg0, %c0_i32 : i32, i32, i32
  }
  func.func @transform_1(%arg0: i32, %arg1: i32) -> (i32, i32, i32) {
    %c0_i32 = arith.constant 0 : i32
    %c0_i32_0 = arith.constant 0 : i32
    return %arg1, %arg0, %c0_i32 : i32, i32, i32
  }
}

</mosaic_0001>

<bundles_post_ra>
// kernel: tpu_custom_call.1
= control target key start
LH: loop header
LB: loop body
LE: loop exit
PB: predicated region body
PF: predicated region fallthrough
CT: control target
= control target key end

     0   :  { %6 = vsyncpa [#allocation4], 0  ;;  %s777_s0 = inlined_call_operand.hbm [shape: f32[8,16,128], index: 0, kind: input, shape index: {}]   ;;  %s778_s1 = inlined_call_operand.hbm [shape: f32[8,16,128], index: 1, kind: output, shape index: {}]  }
   0x1   :  { %8 = vsyncpa [#allocation4 + $0x1], 0 }
   0x2   :  { %9 = vsyncpa [#allocation5], 0 }
   0x3   :  { %11 = vsyncpa [#allocation5 + $0x1], 0  ;;  %s583_s6 = smov 0   ;;  %s585_s7 = smov 0  }
   0x4   :  { %s587_s8 = smov 0   ;;  %s589_s9 = smov 0  }
   0x5   :  { %s591_s10 = smov 0   ;;  %s593_s11 = smov 0  }
   0x6 LB: > { %s354_s12 = sadd.s32 4294967295, %s562_s11   ;;  %s355_s13 = sadd.s32 4294967294, %s562_s11   ;;  %s562_s11 = sphi %s593_s11, %s17_s11   ;;  %s558_s10 = sphi %s591_s10, %s792_s10   ;;  %s554_s9 = sphi %s589_s9, %s791_s9   ;;  %s550_s8 = sphi %s587_s8, %s790_s8   ;;  %s546_s7 = sphi %s585_s7, %s789_s7   ;;  %s542_s6 = sphi %s583_s6, %s788_s6  }
   0x7   : > { %s29_s14 = sadd.s32 1, %s558_s10  ;;  %s38_s15 = sadd.s32 1, %s550_s8 }
   0x8   : > { %p31_p0 = scmp.ge.s32.totalorder %s29_s14, 2  ;;  %p45_p1 = scmp.ne.s32.totalorder %s550_s8, %s546_s7 }
   0x9   : > { %p46_p2 = scmp.eq.s32.totalorder %s562_s11, 0  ;;  %p51_p3 = scmp.ne.s32.totalorder %s546_s7, %s542_s6 }
   0xa   : > { %s794_s14 = smov (%p31_p0, %s29_s14), 0  ;;  %p52_p5 = scmp.eq.s32.totalorder %s354_s12, 0 }
   0xb   : > { %p624_p4 = por %p46_p2, %p45_p1  ;;  %s34_s17 = ssub.s32 %s558_s10, %s794_s14 }
   0xc   : > { %p77_p6 = scmp.eq.s32.totalorder %s354_s12, 1  ;;  %p36_p7 = scmp.eq.s32.totalorder %s34_s17, 0 }
   0xd   : > { %p630_p8 = por %p52_p5, %p51_p3  ;;  %p83_p10 = scmp.eq.s32.totalorder %s355_s13, 1 }
   0xe   : > { %p634_p9 = por %p77_p6, %p45_p1  ;;  %p393_p13 = scmp.lt.s32.totalorder %s562_s11, 2 }
   0xf   : > { %s639_s20 = scalar_select %p36_p7, %s550_s8, %s38_s15  }
  0x10   : > { %s782_s19 = scalar_select %p634_p9, 1, 0 }
  0x11   : > { %p641_p11 = por %p83_p10, %p51_p3  ;;  %s103_s22 = sand.u32 1, %s550_s8  }
  0x12   : > { %s358_s23 = sshll.u32 %s103_s22, 6  ;;  %s359_s24 = sshll.u32 %s558_s10, 7 }
  0x13   : > { %s783_s21 = scalar_select %p641_p11, 1, 0 }
  0x14   : > { %s652_s27 = scalar_lea.hbm %s777_s0, %s359_s24  ;;  %s107_s28 = scalar_lea.vmem [#allocation3], %s358_s23 }
  0x15   : > { %s116_s29 = sshll.u32 %s107_s28, 4  ;;  %p658_p0 = pnand %p393_p13, %p624_p4  ;;  %s654_s29 = int_to_ptr.vmem [resolvable:$true] %s116_s29 }
  0x16   : > { %s662_s2 = scalar_lea.sflag [#allocation4], %s103_s22  ;;  %s450_s3 = scalar_lea.hbm %s652_s27, 1024 }
  0x17   : > { %p451_p1 = scmp.ne.s32.totalorder %s652_s27, %s450_s3  ;;  %p452_p2 = pneg %p658_p0 }
  0x18   : > { %s455_s12 = scalar_lea.hbm %s777_s0, 2048  ;;  %p456_p4 = scmp.lt.u32.totalorder %s652_s27, %s777_s0 }
  0x19   : > { %p453_p3 = pnand %p452_p2, %p451_p1  ;;  %p457_p6 = scmp.lt.u32.totalorder %s455_s12, %s450_s3 }
  0x1a   : > { %p459_p10 = scmp.lt.u32.totalorder %s450_s3, %s652_s27 }
  0x1b   : > { %p454_p5 = pneg %p453_p3  ;;  %p458_p7 = por %p457_p6, %p456_p4 }
  0x1d   : > { %p460_p13 = por %p459_p10, %p458_p7 }
  0x1f   : > { %p461_p12 = pnand %p460_p13, %p454_p5 }
  0x21   : > { %464 = shalt.err (!%p461_p12)
}
  0x22   : > { %s465_s16 = scalar_lea.vmem %s654_s29, 1024  ;;  %s564_s17 = smov [#allocation3]  }
  0x23   : > { %p466_p1 = scmp.ne.s32.totalorder %s654_s29, %s465_s16  ;;  %s470_s22 = sshll.u32 %s564_s17, 4  ;;  %s471_s22 = int_to_ptr.vmem [resolvable:$false] %s470_s22 }
  0x24   : > { %s472_s23 = scalar_lea.vmem %s471_s22, 2048  ;;  %p473_p9 = scmp.lt.s32.totalorder %s654_s29, %s471_s22 }
  0x25   : > { %p468_p3 = pnand %p466_p1, %p452_p2  ;;  %p474_p4 = scmp.lt.s32.totalorder %s472_s23, %s465_s16 }
  0x27   : > { %p469_p11 = pneg %p468_p3  ;;  %p475_p6 = por %p474_p4, %p473_p9 }
  0x29   : > { %p476_p7 = pnand %p475_p6, %p469_p11 }
  0x2b   : > { %479 = shalt.err (!%p476_p7)
}
  0x2c   : > { %s565_s24 = smov 256   ;;  %s566_s25 = smov 128  }
  0x2d   : > { %s567_s26 = smov 8   ;;  %p360_p12 = scmp.ge.s32.totalorder %s562_s11, 1 }
  0x2e   : > { %388 = dma.hbm_to_vmem [thread:$0]  (!%p658_p0), %s652_s27, 1024, %s654_s29, %s662_s2, %s565_s24, %s566_s25, %s567_s26  }
  0x2f   : > { %p124_p2 = scmp.lt.s32.totalorder %s562_s11, 3 }
  0x31   : > { %p125_p5 = pnand %p360_p12, %p124_p2 }
  0x32   : > { %s693_s28 = sand.u32 (!%p125_p5), 1, %s546_s7  }
  0x33   : > { %128 = sbr.rel (%p125_p5) target bundleno = 120 (0x78), region = 24  ;;  %s361_s3 = sshll.u32 (!%p125_p5), %s693_s28, 6 }
  0x34   : > { %s131_s4 = scalar_lea.sflag (!%p125_p5), [#allocation4], %s693_s28  ;;  %s697_s5 = scalar_lea.vmem (!%p125_p5), [#allocation3], %s361_s3 }
  0x3a   : > { %533 = dma.done.wait (%p630_p8), %s131_s4, 1024  }
  0x3b   : > { %535 = vsyncadd (%p630_p8), %s131_s4, 4294966272  ;;  %v162_v0 = vld [vmem:[%s697_s5] sm:$0xff]  ;;  %v568_v1 = vmov 0.0   ;;  %v363_v4 = vld [vmem:[%s697_s5 + $0x8] sm:$0xff]  ;;  %s705_s27 = scalar_lea.vmem [#allocation6], %s361_s3  ;;  %s378_s29 = sshll.u32 %s554_s9, 7 }
  0x3c   : > { %vm164_vm0 = vcmp.gt.f32.partialorder %v162_v0, 1.0  ;;  %v365_v9 = vld [vmem:[%s697_s5 + $0x10] sm:$0xff]  ;;  %v367_v14 = vld [vmem:[%s697_s5 + $0x18] sm:$0xff]  ;;  %v369_v19 = vld [vmem:[%s697_s5 + $0x20] sm:$0xff]  ;;  %s255_s18 = sshll.u32 %s705_s27, 4  ;;  %s727_s12 = scalar_lea.hbm %s778_s1, %s378_s29  ;;  %s722_s18 = int_to_ptr.vmem [resolvable:$true] %s255_s18 }
  0x3d   : > { %v165_v2 = vsel %vm164_vm0, 1.0, %v568_v1  ;;  %v167_v3 = vsel %vm164_vm0, 0.0, %v162_v0  ;;  %v371_v24 = vld [vmem:[%s697_s5 + $0x28] sm:$0xff]  ;;  %v373_v29 = vld [vmem:[%s697_s5 + $0x30] sm:$0xff]  ;;  %v375_v34 = vld [vmem:[%s697_s5 + $0x38] sm:$0xff]  ;;  %s240_s13 = scalar_lea.sflag [#allocation5], %s693_s28 }
  0x3e   : > { %166 = vst [vmem:[%s705_s27] sm:$0xff] %v165_v2  ;;  %v168_v5 = vmul.f32 0.25, %v167_v3  ;;  %s480_s15 = scalar_lea.vmem %s722_s18, 1024  ;;  %p785_p9 = scmp.ne.s32.totalorder %s782_s19, 0 }
  0x3f   : > { %p481_p8 = scmp.ne.s32.totalorder %s722_s18, %s480_s15  ;;  %s569_s9 = smov [#allocation6]  }
  0x40   : > { %v172_v6 = vadd.f32 %v363_v4, %v168_v5  ;;  %s484_s16 = sshll.u32 %s569_s9, 4  ;;  %s485_s16 = int_to_ptr.vmem [resolvable:$false] %s484_s16 }
  0x41   : > { %p482_p11 = pnand %p481_p8, %p785_p9  ;;  %s486_s17 = scalar_lea.vmem %s485_s16, 2048 }
  0x42   : > { %vm173_vm1 = vcmp.gt.f32.partialorder %v172_v6, 1.0  ;;  %p487_p10 = scmp.lt.s32.totalorder %s722_s18, %s485_s16  ;;  %p488_p13 = scmp.lt.s32.totalorder %s486_s17, %s480_s15 }
  0x43   : > { %v174_v7 = vsel %vm173_vm1, 1.0, %v568_v1  ;;  %v177_v8 = vsel %vm173_vm1, 0.0, %v172_v6  ;;  %p483_p0 = pneg %p482_p11 }
  0x44   : > { %364 = vst [vmem:[%s705_s27 + $0x8] sm:$0xff] %v174_v7  ;;  %v178_v10 = vmul.f32 0.25, %v177_v8  ;;  %p489_p1 = por %p488_p13, %p487_p10 }
  0x46   : > { %v182_v11 = vadd.f32 %v365_v9, %v178_v10  ;;  %p490_p3 = pnand %p489_p1, %p483_p0 }
  0x48   : > { %vm183_vm2 = vcmp.gt.f32.partialorder %v182_v11, 1.0 }
  0x49   : > { %v184_v12 = vsel %vm183_vm2, 1.0, %v568_v1  ;;  %v187_v13 = vsel %vm183_vm2, 0.0, %v182_v11 }
  0x4a   : > { %366 = vst [vmem:[%s705_s27 + $0x10] sm:$0xff] %v184_v12  ;;  %v188_v15 = vmul.f32 0.25, %v187_v13 }
  0x4c   : > { %v192_v16 = vadd.f32 %v367_v14, %v188_v15 }
  0x4e   : > { %vm193_vm3 = vcmp.gt.f32.partialorder %v192_v16, 1.0 }
  0x4f   : > { %v194_v17 = vsel %vm193_vm3, 1.0, %v568_v1  ;;  %v197_v18 = vsel %vm193_vm3, 0.0, %v192_v16 }
  0x50   : > { %368 = vst [vmem:[%s705_s27 + $0x18] sm:$0xff] %v194_v17  ;;  %v198_v20 = vmul.f32 0.25, %v197_v18 }
  0x52   : > { %v202_v21 = vadd.f32 %v369_v19, %v198_v20 }
  0x54   : > { %vm203_vm4 = vcmp.gt.f32.partialorder %v202_v21, 1.0 }
  0x55   : > { %v204_v22 = vsel %vm203_vm4, 1.0, %v568_v1  ;;  %v207_v23 = vsel %vm203_vm4, 0.0, %v202_v21 }
  0x56   : > { %370 = vst [vmem:[%s705_s27 + $0x20] sm:$0xff] %v204_v22  ;;  %v208_v25 = vmul.f32 0.25, %v207_v23 }
  0x58   : > { %v212_v26 = vadd.f32 %v371_v24, %v208_v25 }
  0x5a   : > { %vm213_vm5 = vcmp.gt.f32.partialorder %v212_v26, 1.0 }
  0x5b   : > { %v214_v27 = vsel %vm213_vm5, 1.0, %v568_v1  ;;  %v217_v28 = vsel %vm213_vm5, 0.0, %v212_v26 }
  0x5c   : > { %372 = vst [vmem:[%s705_s27 + $0x28] sm:$0xff] %v214_v27  ;;  %v218_v30 = vmul.f32 0.25, %v217_v28 }
  0x5e   : > { %v222_v31 = vadd.f32 %v373_v29, %v218_v30 }
  0x60   : > { %vm223_vm6 = vcmp.gt.f32.partialorder %v222_v31, 1.0 }
  0x61   : > { %v224_v32 = vsel %vm223_vm6, 1.0, %v568_v1  ;;  %v227_v33 = vsel %vm223_vm6, 0.0, %v222_v31 }
  0x62   : > { %374 = vst [vmem:[%s705_s27 + $0x30] sm:$0xff] %v224_v32  ;;  %v228_v35 = vmul.f32 0.25, %v227_v33 }
  0x64   : > { %v232_v36 = vadd.f32 %v375_v34, %v228_v35 }
  0x66   : > { %vm233_vm7 = vcmp.gt.f32.partialorder %v232_v36, 1.0 }
  0x67   : > { %v234_v37 = vsel %vm233_vm7, 1.0, %v568_v1 }
  0x68   : > { %376 = vst [vmem:[%s705_s27 + $0x38] sm:$0xff] %v234_v37 }
  0x69   : > { %493 = shalt.err (!%p490_p3)
}
  0x6a   : > { %s494_s22 = scalar_lea.hbm %s727_s12, 1024  ;;  %s498_s25 = scalar_lea.hbm %s778_s1, 2048 }
  0x6b   : > { %p495_p4 = scmp.ne.s32.totalorder %s727_s12, %s494_s22  ;;  %p499_p12 = scmp.lt.u32.totalorder %s727_s12, %s778_s1 }
  0x6c   : > { %p500_p2 = scmp.lt.u32.totalorder %s498_s25, %s494_s22  ;;  %p502_p8 = scmp.lt.u32.totalorder %s494_s22, %s727_s12 }
  0x6d   : > { %p496_p6 = pnand %p495_p4, %p785_p9 }
  0x6e   : > { %p501_p5 = por %p500_p2, %p499_p12 }
  0x6f   : > { %p497_p7 = pneg %p496_p6 }
  0x70   : > { %p503_p11 = por %p502_p8, %p501_p5 }
  0x72   : > { %p504_p0 = pnand %p503_p11, %p497_p7 }
  0x74   : > { %507 = shalt.err (!%p504_p0)
}
  0x75   : > { %s570_s4 = smov 128   ;;  %s571_s5 = smov 256  }
  0x76   : > { %s572_s27 = smov 8  }
  0x77   : > { %383 = dma.vmem_to_hbm [thread:$0]  (%p785_p9), %s722_s18, 1024, %s727_s12, %s240_s13, %s570_s4, %s571_s5, %s572_s27  }
  0x78 PF: > { %s270_s29 = sand.u32 1, %s542_s6   ;;  %p786_p10 = scmp.ne.s32.totalorder %s783_s21, 0 }
  0x79   : > { %p787_p13 = scmp.ge.s32.totalorder %s562_s11, 2  ;;  %s271_s30 = scalar_lea.sflag [#allocation5], %s270_s29 }
  0x7b   : > { %p390_p1 = pnand %p787_p13, %p786_p10 }
  0x7d   : > { %537 = dma.done.wait (!%p390_p1), %s271_s30, 1024  }
  0x7e   : > { %539 = vsyncadd (!%p390_p1), %s271_s30, 4294966272  ;;  %s17_s11 = sadd.s32 1, %s562_s11   ;;  %s788_s6 = smov %s546_s7 }
  0x7f   : > { %p14_p3 = scmp.ge.s32.totalorder %s17_s11, 4   ;;  %s789_s7 = smov %s550_s8 }
  0x80   : > { %s790_s8 = smov %s639_s20  ;;  %s791_s9 = smov %s558_s10 }
  0x81   : > { %s792_s10 = smov %s794_s14  ;;  %16 = sbr.rel (!%p14_p3) target bundleno = 6 (0x6), region = 87 }
  0x88   :  { %276 = vsyncpa [#allocation4], 1 }
  0x89   :  { %278 = vsyncpa [#allocation4 + $0x1], 1 }
  0x8a   :  { %279 = vsyncpa [#allocation5], 1 }
  0x8b   :  { %281 = vsyncpa [#allocation5 + $0x1], 1 }

</bundles_post_ra>
